<compile_context>
chip_gen: v7x
topology: tpu7x:2x2x1
jax: 0.10.0
libtpu: 0.0.40
codegen_flags: <defaults>
</compile_context>

<pallas_src>
import functools

import jax
import jax.numpy as jnp
from jax.experimental import pallas as pl
from jax.experimental.pallas import tpu as pltpu

_LANE = 128


def _round_up(x, m):
    return (x + m - 1) // m * m


def _choose_row_tiling(n):
    """Pick (row_tile, n_pad): largest row tile whose padding overhead stays small."""
    n128 = _round_up(max(n, _LANE), _LANE)
    row_tile, n_pad = _LANE, n128
    for cand in (256, 512):
        cand_pad = _round_up(n128, cand)
        if n128 >= cand and cand_pad <= int(n128 * 1.0625):
            row_tile, n_pad = cand, cand_pad
    return row_tile, n_pad


def _physical_vmem_bytes():
    try:
        return int(pltpu.get_tpu_info().vmem_capacity_bytes)
    except Exception:
        return 64 * 1024 * 1024      # conservative (v7x per-core VMEM)


def _vmem_bytes(n_pad, z_cols, f_p, h_p, c_p, row_tile, a_resident, fuse_w1):
    """Rough resident-VMEM estimate (double-buffered inputs/outputs + scratch)."""
    a = (2 * n_pad * n_pad if a_resident else 2 * row_tile * n_pad) * 2
    z = 2 * n_pad * z_cols * 2
    w = 2 * h_p * c_p * 2 + (2 * f_p * h_p * 2 if fuse_w1 else 0)
    b = 2 * (h_p + c_p) * 4
    outs = 2 * row_tile * (h_p + c_p) * 4
    scratch = n_pad * c_p * 2
    return a + z + w + b + outs + scratch


def _fused_gcn_kernel(*refs, row_tile, fuse_w1, a_resident):
    if fuse_w1:
        (a_ref, z_ref, w1_ref, b1_ref, w2_ref, b2_ref,
         hidden_ref, out_ref, hw2_scratch) = refs
    else:
        (a_ref, z_ref, b1_ref, w2_ref, b2_ref,
         hidden_ref, out_ref, hw2_scratch) = refs

    p = pl.program_id(0)          # phase: 0 = layer 1, 1 = layer 2
    i = pl.program_id(1)          # row-tile index over nodes
    row0 = pl.multiple_of(i * row_tile, row_tile)

    if a_resident:
        a_rows = a_ref[pl.ds(row0, row_tile), :]   # slice fully-resident A in VMEM
    else:
        a_rows = a_ref[...]                        # streamed (row_tile, n_pad) block

    @pl.when(p == 0)
    def _layer1():
        if fuse_w1:
            # hidden (padded) wider than input features: keep (A @ X) @ W1.
            ax = jnp.dot(a_rows, z_ref[...], preferred_element_type=jnp.float32)
            h = jnp.dot(ax.astype(jnp.bfloat16), w1_ref[...],
                        preferred_element_type=jnp.float32)
        else:
            # Typical GCN (f_in >= hidden): Z = X @ W1 precomputed in the wrapper,
            # so the N^2 term contracts over the narrow hidden width.
            h = jnp.dot(a_rows, z_ref[...], preferred_element_type=jnp.float32)
        h = jnp.maximum(h + b1_ref[...], 0.0)      # f32 epilogue (v5e: no bf16 VPU)
        hidden_ref[...] = h
        # Fold hidden @ W2 into phase 0 per row tile: no f32 full-hidden scratch,
        # no serialized whole-matrix matmul stalling the phase-1 pipeline.
        hw2 = jnp.dot(h.astype(jnp.bfloat16), w2_ref[...],
                      preferred_element_type=jnp.float32)
        hw2_scratch[pl.ds(row0, row_tile), :] = hw2.astype(jnp.bfloat16)

    @pl.when(p == 1)
    def _layer2():
        o = jnp.dot(a_rows, hw2_scratch[...], preferred_element_type=jnp.float32)
        out_ref[...] = o + b2_ref[...]


def fused_gcn_forward(a_hat, x, w1, b1, w2, b2, *, force_a_streaming=False):
    """Both GCN layers in one pallas_call. Returns (hidden, out) unpadded."""
    n, f_in = x.shape
    hidden_dim = w1.shape[1]
    num_class = w2.shape[1]

    row_tile, n_pad = _choose_row_tiling(n)
    nrt = n_pad // row_tile
    f_p = _round_up(f_in, _LANE)
    h_p = _round_up(hidden_dim, _LANE)
    c_p = _round_up(num_class, _LANE)

    # Layer-1 association picked from the padded shapes.
    fuse_w1 = f_p < h_p

    # bf16 MXU operands, cast BEFORE padding (avoid padded f32 temporaries).
    if fuse_w1:
        z = jnp.pad(x.astype(jnp.bfloat16), ((0, n_pad - n), (0, f_p - f_in)))
        z_cols = f_p
        w1_p = jnp.pad(w1.astype(jnp.bfloat16),
                       ((0, f_p - f_in), (0, h_p - hidden_dim)))
    else:
        xw1 = jnp.dot(x.astype(jnp.float32), w1.astype(jnp.float32))  # cheap: N*f*h
        z = jnp.pad(xw1.astype(jnp.bfloat16),
                    ((0, n_pad - n), (0, h_p - hidden_dim)))
        z_cols = h_p
        w1_p = None
    a_p = jnp.pad(a_hat.astype(jnp.bfloat16), ((0, n_pad - n), (0, n_pad - n)))
    w2_p = jnp.pad(w2.astype(jnp.bfloat16),
                   ((0, h_p - hidden_dim), (0, c_p - num_class)))
    b1_p = jnp.pad(b1.reshape(1, -1).astype(jnp.float32),
                   ((0, 0), (0, h_p - hidden_dim)))
    b2_p = jnp.pad(b2.reshape(1, -1).astype(jnp.float32),
                   ((0, 0), (0, c_p - num_class)))

    # Generation-aware VMEM budget (v7x: 64 MiB physical, v5e/v6e: 128 MiB).
    vmem_budget = int(0.8 * _physical_vmem_bytes())
    a_resident = (not force_a_streaming) and (
        _vmem_bytes(n_pad, z_cols, f_p, h_p, c_p, row_tile, True, fuse_w1)
        <= vmem_budget)
    vmem_need = _vmem_bytes(n_pad, z_cols, f_p, h_p, c_p, row_tile,
                            a_resident, fuse_w1)
    vmem_limit = int(min(vmem_budget, max(2 * vmem_need, 32 * 1024 * 1024)))

    if a_resident:
        # A read from HBM once, sliced per row tile inside the kernel.
        a_spec = pl.BlockSpec((n_pad, n_pad), lambda p, i: (0, 0))
    else:
        # Stream A row blocks (read twice from HBM, once per phase).
        a_spec = pl.BlockSpec((row_tile, n_pad), lambda p, i: (i, 0))

    in_specs = [a_spec,
                pl.BlockSpec((n_pad, z_cols), lambda p, i: (0, 0))]
    inputs = [a_p, z]
    if fuse_w1:
        in_specs.append(pl.BlockSpec((f_p, h_p), lambda p, i: (0, 0)))
        inputs.append(w1_p)
    in_specs += [pl.BlockSpec((1, h_p), lambda p, i: (0, 0)),
                 pl.BlockSpec((h_p, c_p), lambda p, i: (0, 0)),
                 pl.BlockSpec((1, c_p), lambda p, i: (0, 0))]
    inputs += [b1_p, w2_p, b2_p]

    out_specs = [
        # hidden is written in phase 0; in phase 1 pin to the last block so the
        # untouched output buffer never clobbers valid data on writeback.
        pl.BlockSpec((row_tile, h_p),
                     lambda p, i: ((1 - p) * i + p * (nrt - 1), 0)),
        # out is written in phase 1; in phase 0 pin to block 0 (only flushed after
        # grid step (1, 0) has written it).
        pl.BlockSpec((row_tile, c_p), lambda p, i: (p * i, 0)),
    ]

    if fuse_w1:
        flops = 2 * (n_pad * n_pad * f_p + n_pad * f_p * h_p)
    else:
        flops = 2 * n_pad * n_pad * h_p
    flops += 2 * (n_pad * h_p * c_p + n_pad * n_pad * c_p)
    a_reads = 1 if a_resident else 2
    bytes_accessed = (a_reads * n_pad * n_pad * 2 + n_pad * z_cols * 2
                      + (f_p * h_p * 2 if fuse_w1 else 0) + h_p * c_p * 2
                      + (h_p + c_p) * 4 + n_pad * (h_p + c_p) * 4)

    kernel = functools.partial(_fused_gcn_kernel, row_tile=row_tile,
                               fuse_w1=fuse_w1, a_resident=a_resident)

    hidden_p, out_p = pl.pallas_call(
        kernel,
        out_shape=(jax.ShapeDtypeStruct((n_pad, h_p), jnp.float32),
                   jax.ShapeDtypeStruct((n_pad, c_p), jnp.float32)),
        grid_spec=pltpu.PrefetchScalarGridSpec(
            num_scalar_prefetch=0,
            grid=(2, nrt),                                        # (phase, row tile)
            in_specs=in_specs,
            out_specs=out_specs,
            scratch_shapes=[pltpu.VMEM((n_pad, c_p), jnp.bfloat16)],   # hidden @ W2
        ),
        compiler_params=pltpu.CompilerParams(
            # Phase 1 consumes all of phase 0's hw2 scratch -> both axes sequential.
            dimension_semantics=("arbitrary", "arbitrary"),
            vmem_limit_bytes=vmem_limit,
        ),
        cost_estimate=pl.CostEstimate(flops=flops, transcendentals=0,
                                      bytes_accessed=bytes_accessed),
    )(*inputs)

    return hidden_p[:n, :hidden_dim], out_p[:n, :num_class]


def build_normalized_adjacency(edge_index, num_nodes):
    """Dense symmetric-normalized adjacency with self loops (glue JAX, not hot path)."""
    src, dst = edge_index[0], edge_index[1]
    a = jnp.zeros((num_nodes, num_nodes), jnp.float32)
    a = a.at[src, dst].set(1.0)
    a = a.at[dst, src].set(1.0)                                   # undirected
    # Self loops: force diagonal to exactly 1.0 even if edge_index already has them.
    a = jnp.maximum(a, jnp.eye(num_nodes, dtype=jnp.float32))
    deg = jnp.sum(a, axis=1)
    d_inv_sqrt = jnp.where(deg > 0, jax.lax.rsqrt(deg), 0.0)
    return a * d_inv_sqrt[:, None] * d_inv_sqrt[None, :]


def py_model_forward(x, edge_index, params, *, force_a_streaming=False):
    """PYModel.forward: returns (hidden, out). Dropout is identity in eval mode."""
    a_hat = build_normalized_adjacency(edge_index, x.shape[0])
    return fused_gcn_forward(a_hat, x, params["w1"], params["b1"],
                             params["w2"], params["b2"],
                             force_a_streaming=force_a_streaming)


def reference_forward(x, edge_index, params):
    """Pure-JAX f32 reference of the same forward pass."""
    a_hat = build_normalized_adjacency(edge_index, x.shape[0])
    hidden = jnp.maximum(a_hat @ x @ params["w1"] + params["b1"], 0.0)
    out = a_hat @ hidden @ params["w2"] + params["b2"]
    return hidden, out


def init_params(key, input_dim, hidden_dim, num_class):
    k1, k2 = jax.random.split(key)
    scale1 = 1.0 / jnp.sqrt(jnp.float32(input_dim))
    scale2 = 1.0 / jnp.sqrt(jnp.float32(hidden_dim))
    return {
        "w1": jax.random.normal(k1, (input_dim, hidden_dim), jnp.float32) * scale1,
        "b1": jnp.zeros((1, hidden_dim), jnp.float32),
        "w2": jax.random.normal(k2, (hidden_dim, num_class), jnp.float32) * scale2,
        "b2": jnp.zeros((1, num_class), jnp.float32),
    }


if __name__ == "__main__":
    base_key = jax.random.PRNGKey(0)

    def run_case(case_id, n, f_in, hidden_dim, num_class, n_edges, force_stream):
        kx, ke, kp = jax.random.split(jax.random.fold_in(base_key, case_id), 3)
        x = jax.random.normal(kx, (n, f_in), jnp.float32)
        edge_index = jax.random.randint(ke, (2, n_edges), 0, n, jnp.int32)
        params = init_params(kp, f_in, hidden_dim, num_class)

        fwd = jax.jit(functools.partial(py_model_forward,
                                        force_a_streaming=force_stream))
        hidden, out = fwd(x, edge_index, params)
        jax.block_until_ready((hidden, out))

        assert hidden.shape == (n, hidden_dim)
        assert out.shape == (n, num_class)

        h_ref, o_ref = reference_forward(x, edge_index, params)
        assert jnp.allclose(hidden, h_ref, rtol=5e-2, atol=5e-2), f"hidden case {case_id}"
        assert jnp.allclose(out, o_ref, rtol=5e-2, atol=5e-2), f"out case {case_id}"

    # Case 0: typical GCN shapes (f_in > hidden): precomputed X@W1 path, 3 row tiles.
    run_case(0, n=300, f_in=256, hidden_dim=64, num_class=7, n_edges=900,
             force_stream=False)
    # Case 1: hidden > f_in: fused (A@X)@W1 path, single row tile.
    run_case(1, n=100, f_in=16, hidden_dim=200, num_class=4, n_edges=300,
             force_stream=False)
    # Case 2: same as case 0 but forcing the streamed-A row pipeline (large-graph path).
    run_case(2, n=300, f_in=256, hidden_dim=64, num_class=7, n_edges=900,
             force_stream=True)

    print("KERNEL_OK")
</pallas_src>

<mosaic_0001>
module attributes {stable_mosaic.version = 11 : i64} {
  func.func @_fused_gcn_kernel(%arg0: i32, %arg1: i32, %arg2: memref<384x384xbf16, #tpu.memory_space<vmem>>, %arg3: memref<384x128xbf16, #tpu.memory_space<vmem>>, %arg4: memref<1x128xf32, #tpu.memory_space<vmem>>, %arg5: memref<128x128xbf16, #tpu.memory_space<vmem>>, %arg6: memref<1x128xf32, #tpu.memory_space<vmem>>, %arg7: memref<128x128xf32, #tpu.memory_space<vmem>>, %arg8: memref<128x128xf32, #tpu.memory_space<vmem>>, %arg9: memref<384x128xbf16, #tpu.memory_space<vmem>>) attributes {dimension_semantics = [#tpu.dimension_semantics<arbitrary>, #tpu.dimension_semantics<arbitrary>], iteration_bounds = array<i64: 2, 3>, scalar_prefetch = 0 : i64, scratch_operands = 1 : i64, tpu.core_type = #tpu.core_type<tc>, window_params = [{pipeline_mode = #tpu.pipeline_mode<synchronous>, transform_indices = @transform_0, window_bounds = array<i64: 384, 384>}, {pipeline_mode = #tpu.pipeline_mode<synchronous>, transform_indices = @transform_1, window_bounds = array<i64: 384, 128>}, {pipeline_mode = #tpu.pipeline_mode<synchronous>, transform_indices = @transform_2, window_bounds = array<i64: 1, 128>}, {pipeline_mode = #tpu.pipeline_mode<synchronous>, transform_indices = @transform_3, window_bounds = array<i64: 128, 128>}, {pipeline_mode = #tpu.pipeline_mode<synchronous>, transform_indices = @transform_4, window_bounds = array<i64: 1, 128>}, {transform_indices = @transform_5, window_bounds = array<i64: 128, 128>}, {transform_indices = @transform_6, window_bounds = array<i64: 128, 128>}]} {
    %c128_i32 = arith.constant 128 : i32
    %0 = arith.muli %arg1, %c128_i32 : i32
    %1 = tpu.assume_multiple %0, 128 : i32
    %2 = arith.index_cast %1 : i32 to index
    %c0 = arith.constant 0 : index
    %3 = vector.load %arg2[%2, %c0] : memref<384x384xbf16, #tpu.memory_space<vmem>>, vector<128x384xbf16>
    %c0_i32 = arith.constant 0 : i32
    %4 = arith.cmpi eq, %arg0, %c0_i32 : i32
    %5 = arith.extui %4 : i1 to i32
    %c0_i32_0 = arith.constant 0 : i32
    %6 = arith.cmpi ne, %5, %c0_i32_0 : i32
    scf.if %6 {
      %c0_2 = arith.constant 0 : index
      %c0_3 = arith.constant 0 : index
      %10 = vector.load %arg3[%c0_2, %c0_3] : memref<384x128xbf16, #tpu.memory_space<vmem>>, vector<384x128xbf16>
      %cst = arith.constant dense<0.000000e+00> : vector<128x128xf32>
      %11 = tpu.matmul %3, %10, %cst {dimension_numbers = #tpu.dot_dimension_numbers<[1], [0], [0], [1], [0, 0, 1, 1], [], []>} : vector<128x384xbf16>, vector<384x128xbf16>, vector<128x128xf32> -> vector<128x128xf32>
      %c0_4 = arith.constant 0 : index
      %c0_5 = arith.constant 0 : index
      %12 = vector.load %arg4[%c0_4, %c0_5] : memref<1x128xf32, #tpu.memory_space<vmem>>, vector<1x128xf32>
      %13 = vector.broadcast %12 : vector<1x128xf32> to vector<128x128xf32>
      %14 = arith.addf %11, %13 : vector<128x128xf32>
      %cst_6 = arith.constant 0.000000e+00 : f32
      %15 = vector.broadcast %cst_6 : f32 to vector<128x128xf32>
      %16 = arith.maximumf %14, %15 : vector<128x128xf32>
      %c0_7 = arith.constant 0 : index
      %c0_8 = arith.constant 0 : index
      %17 = vector.load %arg7[%c0_7, %c0_8] : memref<128x128xf32, #tpu.memory_space<vmem>>, vector<128x128xf32>
      tpu.vector_store %arg7[%c0_7, %c0_8], %16 {strides = array<i32>} : memref<128x128xf32, #tpu.memory_space<vmem>>, vector<128x128xf32>,
      %18 = arith.truncf %16 : vector<128x128xf32> to vector<128x128xbf16>
      %c0_9 = arith.constant 0 : index
      %c0_10 = arith.constant 0 : index
      %19 = vector.load %arg5[%c0_9, %c0_10] : memref<128x128xbf16, #tpu.memory_space<vmem>>, vector<128x128xbf16>
      %cst_11 = arith.constant dense<0.000000e+00> : vector<128x128xf32>
      %20 = tpu.matmul %18, %19, %cst_11 {dimension_numbers = #tpu.dot_dimension_numbers<[1], [0], [0], [1], [0, 0, 1, 1], [], []>} : vector<128x128xbf16>, vector<128x128xbf16>, vector<128x128xf32> -> vector<128x128xf32>
      %21 = arith.truncf %20 : vector<128x128xf32> to vector<128x128xbf16>
      %22 = arith.index_cast %1 : i32 to index
      %c0_12 = arith.constant 0 : index
      %23 = vector.load %arg9[%22, %c0_12] : memref<384x128xbf16, #tpu.memory_space<vmem>>, vector<128x128xbf16>
      tpu.vector_store %arg9[%22, %c0_12], %21 {strides = array<i32>} : memref<384x128xbf16, #tpu.memory_space<vmem>>, vector<128x128xbf16>,
    } else {
    }
    %c1_i32 = arith.constant 1 : i32
    %7 = arith.cmpi eq, %arg0, %c1_i32 : i32
    %8 = arith.extui %7 : i1 to i32
    %c0_i32_1 = arith.constant 0 : i32
    %9 = arith.cmpi ne, %8, %c0_i32_1 : i32
    scf.if %9 {
      %c0_2 = arith.constant 0 : index
      %c0_3 = arith.constant 0 : index
      %10 = vector.load %arg9[%c0_2, %c0_3] : memref<384x128xbf16, #tpu.memory_space<vmem>>, vector<384x128xbf16>
      %cst = arith.constant dense<0.000000e+00> : vector<128x128xf32>
      %11 = tpu.matmul %3, %10, %cst {dimension_numbers = #tpu.dot_dimension_numbers<[1], [0], [0], [1], [0, 0, 1, 1], [], []>} : vector<128x384xbf16>, vector<384x128xbf16>, vector<128x128xf32> -> vector<128x128xf32>
      %c0_4 = arith.constant 0 : index
      %c0_5 = arith.constant 0 : index
      %12 = vector.load %arg6[%c0_4, %c0_5] : memref<1x128xf32, #tpu.memory_space<vmem>>, vector<1x128xf32>
      %13 = vector.broadcast %12 : vector<1x128xf32> to vector<128x128xf32>
      %14 = arith.addf %11, %13 : vector<128x128xf32>
      %c0_6 = arith.constant 0 : index
      %c0_7 = arith.constant 0 : index
      %15 = vector.load %arg8[%c0_6, %c0_7] : memref<128x128xf32, #tpu.memory_space<vmem>>, vector<128x128xf32>
      tpu.vector_store %arg8[%c0_6, %c0_7], %14 {strides = array<i32>} : memref<128x128xf32, #tpu.memory_space<vmem>>, vector<128x128xf32>,
    } else {
    }
    return
  }
  func.func @transform_0(%arg0: i32, %arg1: i32) -> (i32, i32) {
    %c0_i32 = arith.constant 0 : i32
    %c0_i32_0 = arith.constant 0 : i32
    %c0_i32_1 = arith.constant 0 : i32
    return %c0_i32, %c0_i32_0 : i32, i32
  }
  func.func @transform_1(%arg0: i32, %arg1: i32) -> (i32, i32) {
    %c0_i32 = arith.constant 0 : i32
    %c0_i32_0 = arith.constant 0 : i32
    %c0_i32_1 = arith.constant 0 : i32
    return %c0_i32, %c0_i32_0 : i32, i32
  }
  func.func @transform_2(%arg0: i32, %arg1: i32) -> (i32, i32) {
    %c0_i32 = arith.constant 0 : i32
    %c0_i32_0 = arith.constant 0 : i32
    %c0_i32_1 = arith.constant 0 : i32
    return %c0_i32, %c0_i32_0 : i32, i32
  }
  func.func @transform_3(%arg0: i32, %arg1: i32) -> (i32, i32) {
    %c0_i32 = arith.constant 0 : i32
    %c0_i32_0 = arith.constant 0 : i32
    %c0_i32_1 = arith.constant 0 : i32
    return %c0_i32, %c0_i32_0 : i32, i32
  }
  func.func @transform_4(%arg0: i32, %arg1: i32) -> (i32, i32) {
    %c0_i32 = arith.constant 0 : i32
    %c0_i32_0 = arith.constant 0 : i32
    %c0_i32_1 = arith.constant 0 : i32
    return %c0_i32, %c0_i32_0 : i32, i32
  }
  func.func @transform_5(%arg0: i32, %arg1: i32) -> (i32, i32) {
    %c1_i32 = arith.constant 1 : i32
    %0 = arith.subi %c1_i32, %arg0 : i32
    %1 = arith.muli %0, %arg1 : i32
    %c2_i32 = arith.constant 2 : i32
    %2 = arith.muli %arg0, %c2_i32 : i32
    %3 = arith.addi %1, %2 : i32
    %c0_i32 = arith.constant 0 : i32
    %c0_i32_0 = arith.constant 0 : i32
    return %3, %c0_i32 : i32, i32
  }
  func.func @transform_6(%arg0: i32, %arg1: i32) -> (i32, i32) {
    %0 = arith.muli %arg0, %arg1 : i32
    %c0_i32 = arith.constant 0 : i32
    %c0_i32_0 = arith.constant 0 : i32
    return %0, %c0_i32 : i32, i32
  }
}

</mosaic_0001>

<bundles_post_ra>
// kernel: py_model_forward.1
= control target key start
LH: loop header
LB: loop body
LE: loop exit
PB: predicated region body
PF: predicated region fallthrough
CT: control target
= control target key end

     0   :  { %s2071_s21 = smov 0   ;;  %s2073_s22 = smov 0   ;;  %s2515_s0 = inlined_call_operand.vmem [shape: bf16[384,384], index: 0, kind: input, shape index: {}]   ;;  %s2516_s1 = inlined_call_operand.vmem [shape: bf16[384,128], index: 1, kind: input, shape index: {}]   ;;  %s2517_s2 = inlined_call_operand.vmem [shape: f32[1,128], index: 2, kind: input, shape index: {}]   ;;  %s2518_s3 = inlined_call_operand.vmem [shape: bf16[128,128], index: 3, kind: input, shape index: {}]   ;;  %s2519_s4 = inlined_call_operand.vmem [shape: f32[1,128], index: 4, kind: input, shape index: {}]   ;;  %s2520_s5 = inlined_call_operand.vmem [shape: f32[384,128], index: 5, kind: output, shape index: {0}]   ;;  %s2521_s6 = inlined_call_operand.vmem [shape: f32[384,128], index: 6, kind: output, shape index: {1}]  }
   0x1   :  { %s2075_s23 = smov 0   ;;  %s2077_s24 = smov 0  }
   0x2   :  { %s2079_s25 = smov 0  }
   0x3 LB: > { %s26_s26 = sadd.s32 1, %s2026_s23  ;;  %s29_s27 = sadd.s32 1, %s2030_s24  ;;  %s2034_s25 = sphi %s2079_s25, %s17_s25   ;;  %s2030_s24 = sphi %s2077_s24, %s2525_s24   ;;  %s2026_s23 = sphi %s2075_s23, %s2524_s23   ;;  %s2022_s22 = sphi %s2073_s22, %s2523_s22   ;;  %s2018_s21 = sphi %s2071_s21, %s2522_s21  }
   0x4   : > { %p27_p0 = scmp.ge.s32.totalorder %s26_s26, 3  ;;  %p1556_p1 = scmp.ge.s32.totalorder %s2034_s25, 1 }
   0x5   : > { %p227_p2 = scmp.lt.s32.totalorder %s2034_s25, 7 }
   0x6   : > { %s2527_s26 = smov (%p27_p0, %s26_s26), 0  ;;  %s2529_s27 = smov (!%p27_p0, %s29_s27), %s2030_s24 }
   0x7   : > { %p228_p3 = pnand %p1556_p1, %p227_p2  ;;  %p31_p4 = scmp.ge.s32.totalorder %s2529_s27, 2 }
   0x8   : > { %s262_s28 = ssub.s32 (!%p228_p3), 1, %s2022_s22  ;;  %s1557_s29 = sshll.u32 (!%p228_p3), %s2022_s22, 1 }
   0x9   : > { %s2531_s27 = smov (%p31_p4, %s2529_s27), 0  ;;  %231 = sbr.rel (%p228_p3) target bundleno = 875 (0x36b), region = 40 }
   0xa   : > { %s263_s30 = smul.u32 (!%p228_p3), %s2018_s21, %s262_s28  ;;  %s1562_s7 = sshll.u32 (!%p228_p3), %s2018_s21, 7 }
   0xb   : > { %s276_s8 = smul.u32 (!%p228_p3), %s2018_s21, %s2022_s22  ;;  %s286_s9 = sshra.s32 (!%p228_p3), %s1562_s7, 3 }
   0xc   : > { %s265_s10 = sadd.s32 (!%p228_p3), %s1557_s29, %s263_s30  ;;  %s1651_s11 = smul.u32 (!%p228_p3), 12, %s286_s9 }
   0xd   : > { %s1558_s12 = sshll.u32 (!%p228_p3), %s265_s10, 4  ;;  %s1560_s13 = sshll.u32 (!%p228_p3), %s276_s8, 4 }
   0xe   : > { %p267_p5 = scmp.lt.s32.totalorder (!%p228_p3), %s1558_s12, 47  ;;  %p278_p6 = scmp.lt.s32.totalorder (!%p228_p3), %s1560_s13, 47 }
   0xf   : > { %s2116_s16 = scalar_lea.vmem (!%p228_p3), %s2515_s0, %s1651_s11  ;;  %p1564_p7 = scmp.ne.s32.totalorder (!%p228_p3), %s2022_s22, 0 }
  0x10   : > { %s2533_s12 = smov (!%p267_p5, %s1558_s12), 47  ;;  %v2119_v0 = vld [vmem:[%s2116_s16] sm:$0xff]  ;;  %v2122_v1 = vld [vmem:[%s2116_s16 + $0x8] sm:$0xf]  ;;  %v2125_v2 = vld [vmem:[%s2116_s16 + $0xc] sm:$0xff]  ;;  %s2535_s13 = smov (!%p278_p6, %s1560_s13), 47 }
  0x11   : > { %v2128_v3 = vld [vmem:[%s2116_s16 + $0x14] sm:$0xf]  ;;  %v2131_v4 = vld [vmem:[%s2116_s16 + $0x18] sm:$0xff]  ;;  %v2134_v5 = vld [vmem:[%s2116_s16 + $0x20] sm:$0xf]  ;;  %s1559_s17 = sshll.u32 %s2533_s12, 3  ;;  %v1567_v33 = vcombine.high (!%p1564_p7), %v2119_v0, %v2125_v2  ;;  %v1566_v58 = vcombine.low (!%p1564_p7), %v2119_v0, %v2125_v2 }
  0x12   : > { %v2137_v6 = vld [vmem:[%s2116_s16 + $0x24] sm:$0xff]  ;;  %v2140_v7 = vld [vmem:[%s2116_s16 + $0x2c] sm:$0xf]  ;;  %v2143_v8 = vld [vmem:[%s2116_s16 + $0x30] sm:$0xff]  ;;  %s2148_s20 = scalar_lea.vmem %s2520_s5, %s1559_s17  ;;  %s1561_s28 = sshll.u32 %s2535_s13, 3  ;;  %v1568_v34 = vcombine.low (!%p1564_p7), %v2122_v1, %v2128_v3 }
  0x13   : > { %v2151_v9 = vld [vmem:[%s2116_s16 + $0x38] sm:$0xf]  ;;  %v2154_v10 = vld [vmem:[%s2116_s16 + $0x3c] sm:$0xff]  ;;  %v2157_v11 = vld [vmem:[%s2116_s16 + $0x44] sm:$0xf]  ;;  %s2162_s8 = scalar_lea.vmem %s2521_s6, %s1561_s28  ;;  %686 = vmatprep.mubr.bf16.mxu0 (!%p1564_p7), %v1567_v33  ;;  %v1570_v59 = vcombine.high (!%p1564_p7), %v2131_v4, %v2137_v6  ;;  %v1571_v61 = vcombine.low (!%p1564_p7), %v2134_v5, %v2140_v7  ;;  %s1057_s19 = sshra.s32 (!%p1564_p7), %s1562_s7, 4 }
  0x14   : > { %v2165_v12 = vld [vmem:[%s2116_s16 + $0x48] sm:$0xff]  ;;  %v2168_v13 = vld [vmem:[%s2116_s16 + $0x50] sm:$0xf]  ;;  %v2171_v14 = vld [vmem:[%s2116_s16 + $0x54] sm:$0xff]  ;;  %326 = sbr.rel (%p1564_p7) target bundleno = 558 (0x22e), region = 44  ;;  %1844 = vmatprep.mubr.bf16.mxu1 (!%p1564_p7), %v1568_v34  ;;  %v1574_v62 = vcombine.low (!%p1564_p7), %v2151_v9, %v2157_v11  ;;  %v1573_v33 = vcombine.high (!%p1564_p7), %v2143_v8, %v2154_v10  ;;  %s1622_s28 = sshll.u32 (!%p1564_p7), %s1057_s19, 3 }
  0x15   : > { %v2174_v15 = vld [vmem:[%s2116_s16 + $0x5c] sm:$0xf]  ;;  %v2177_v16 = vld [vmem:[%s2116_s16 + $0x60] sm:$0xff]  ;;  %v2180_v17 = vld [vmem:[%s2116_s16 + $0x68] sm:$0xf]  ;;  %s1060_s29 = scalar_lea.vmem (!%p1564_p7), [#allocation2], %s1622_s28 }
  0x16   : > { %v2183_v18 = vld [vmem:[%s2116_s16 + $0x6c] sm:$0xff]  ;;  %v2186_v19 = vld [vmem:[%s2116_s16 + $0x74] sm:$0xf]  ;;  %v2189_v20 = vld [vmem:[%s2116_s16 + $0x78] sm:$0xff] }
  0x17   : > { %v2192_v21 = vld [vmem:[%s2116_s16 + $0x80] sm:$0xf]  ;;  %v2195_v22 = vld [vmem:[%s2116_s16 + $0x84] sm:$0xff]  ;;  %v2198_v23 = vld [vmem:[%s2116_s16 + $0x8c] sm:$0xf] }
  0x18   : > { %v2201_v24 = vld [vmem:[%s2116_s16 + $0x90] sm:$0xff]  ;;  %v2204_v25 = vld [vmem:[%s2116_s16 + $0x98] sm:$0xf]  ;;  %v2207_v26 = vld [vmem:[%s2116_s16 + $0x9c] sm:$0xff] }
  0x19   : > { %v2210_v27 = vld [vmem:[%s2116_s16 + $0xa4] sm:$0xf]  ;;  %v2213_v28 = vld [vmem:[%s2116_s16 + $0xa8] sm:$0xff]  ;;  %v2216_v29 = vld [vmem:[%s2116_s16 + $0xb0] sm:$0xf] }
  0x1a   : > { %v2219_v30 = vld [vmem:[%s2116_s16 + $0xb4] sm:$0xff]  ;;  %v2222_v31 = vld [vmem:[%s2116_s16 + $0xbc] sm:$0xf]  ;;  %v1964_v32 = vld [vmem:[%s2516_s1 + $0x40] sm:$0xff] (!%p1564_p7)  }
  0x1b   : > { %v1965_v35 = vld [vmem:[%s2516_s1] sm:$0xff]   ;;  %1652 = vmatprep.subr.bf16.mxu0 %v1964_v32  ;;  %v1966_v36 = vld [vmem:[%s2516_s1 + $0x48] sm:$0xff]   ;;  %v1969_v39 = vld [vmem:[%s2516_s1 + $0x50] sm:$0xff]   ;;  %v1569_v32 = vcombine.low %v2131_v4, %v2137_v6 }
  0x1c   : > { %1653 = vmatpush3.bf16.msra.mxu0 %v1965_v35  ;;  %v1967_v37 = vld [vmem:[%s2516_s1 + $0x80] sm:$0xff]   ;;  %v1968_v38 = vld [vmem:[%s2516_s1 + $0x8] sm:$0xff]   ;;  %v1971_v41 = vld [vmem:[%s2516_s1 + $0x10] sm:$0xff]   ;;  %v1577_v35 = vcombine.low %v2168_v13, %v2174_v15 }
  0x1d   : > { %1654 = vmatprep.subr.bf16.mxu0 %v1966_v36  ;;  %1828 = vmatprep.subr.bf16.mxu1 %v1967_v37  ;;  %v1970_v40 = vld [vmem:[%s2516_s1 + $0x88] sm:$0xff]   ;;  %v1972_v42 = vld [vmem:[%s2516_s1 + $0x58] sm:$0xff]   ;;  %v1973_v43 = vld [vmem:[%s2516_s1 + $0x90] sm:$0xff]   ;;  %v1580_v36 = vcombine.low %v2180_v17, %v2186_v19 }
  0x1e   : > { %1829 = vmatpush3.bf16.msra.mxu1 %v1967_v37  ;;  %v1974_v44 = vld [vmem:[%s2516_s1 + $0x18] sm:$0xff]   ;;  %v1975_v45 = vld [vmem:[%s2516_s1 + $0x60] sm:$0xff]   ;;  %v1978_v49 = vld [vmem:[%s2516_s1 + $0x68] sm:$0xff]   ;;  %v1572_v37 = vcombine.low %v2143_v8, %v2154_v10 }
  0x1f   : > { %1830 = vmatprep.subr.bf16.mxu1 %v1970_v40  ;;  %v1976_v46 = vld [vmem:[%s2516_s1 + $0x98] sm:$0xff]   ;;  %v1977_v47 = vld [vmem:[%s2516_s1 + $0x20] sm:$0xff]   ;;  %v1980_v50 = vld [vmem:[%s2516_s1 + $0x28] sm:$0xff]  }
  0x20   : > { %1655 = vmatpush3.bf16.msra.mxu0 %v1968_v38  ;;  %v1979_v48 = vld [vmem:[%s2516_s1 + $0xa0] sm:$0xff]   ;;  %v1982_v51 = vld [vmem:[%s2516_s1 + $0xa8] sm:$0xff]   ;;  %v1981_v52 = vld [vmem:[%s2516_s1 + $0x70] sm:$0xff]   ;;  %v1576_v38 = vcombine.high %v2165_v12, %v2171_v14 }
  0x21   : > { %1656 = vmatprep.subr.bf16.mxu0 %v1969_v39  ;;  %v1983_v53 = vld [vmem:[%s2516_s1 + $0x30] sm:$0xff]   ;;  %v1984_v55 = vld [vmem:[%s2516_s1 + $0x78] sm:$0xff]   ;;  %v1988_v60 = vld [vmem:[%s2518_s3] sm:$0xff]   ;;  %v1583_v39 = vcombine.low %v2192_v21, %v2198_v23 }
  0x22   : > { %1831 = vmatpush3.bf16.msra.mxu1 %v1970_v40  ;;  %v1985_v54 = vld [vmem:[%s2516_s1 + $0xb0] sm:$0xff]   ;;  %v1986_v56 = vld [vmem:[%s2516_s1 + $0x38] sm:$0xff]   ;;  %v1989_v63 = vld [vmem:[%s2518_s3 + $0x8] sm:$0xff]   ;;  %v1586_v40 = vcombine.low %v2204_v25, %v2210_v27 }
  0x23   : > { %1832 = vmatprep.subr.bf16.mxu1 %v1973_v43  ;;  %v1987_v57 = vld [vmem:[%s2516_s1 + $0xb8] sm:$0xff]   ;;  %v1990_v34 = vld [vmem:[%s2518_s3 + $0x10] sm:$0xff]  }
  0x24   : > { %1657 = vmatpush3.bf16.msra.mxu0 %v1971_v41  ;;  %v1575_v41 = vcombine.low %v2165_v12, %v2171_v14 }
  0x25   : > { %1658 = vmatprep.subr.bf16.mxu0 %v1972_v42  ;;  %v1579_v42 = vcombine.high %v2177_v16, %v2183_v18 }
  0x26   : > { %1833 = vmatpush3.bf16.msra.mxu1 %v1973_v43  ;;  %v1589_v43 = vcombine.low %v2216_v29, %v2222_v31 }
  0x27   : > { %1834 = vmatprep.subr.bf16.mxu1 %v1976_v46 }
  0x28   : > { %1659 = vmatpush3.bf16.msra.mxu0 %v1974_v44  ;;  %v1578_v44 = vcombine.low %v2177_v16, %v2183_v18 }
  0x29   : > { %1660 = vmatprep.subr.bf16.mxu0 %v1975_v45  ;;  %v1582_v45 = vcombine.high %v2189_v20, %v2195_v22 }
  0x2a   : > { %1835 = vmatpush3.bf16.msra.mxu1 %v1976_v46  ;;  %v1581_v46 = vcombine.low %v2189_v20, %v2195_v22 }
  0x2b   : > { %1836 = vmatprep.subr.bf16.mxu1 %v1979_v48 }
  0x2c   : > { %1661 = vmatpush3.bf16.msra.mxu0 %v1977_v47  ;;  %v1585_v47 = vcombine.high %v2201_v24, %v2207_v26 }
  0x2d   : > { %1662 = vmatprep.subr.bf16.mxu0 %v1978_v49  ;;  %v1588_v49 = vcombine.high %v2213_v28, %v2219_v30 }
  0x2e   : > { %1837 = vmatpush3.bf16.msra.mxu1 %v1979_v48  ;;  %v1584_v48 = vcombine.low %v2201_v24, %v2207_v26 }
  0x2f   : > { %1838 = vmatprep.subr.bf16.mxu1 %v1982_v51 }
  0x30   : > { %1663 = vmatpush3.bf16.msra.mxu0 %v1980_v50  ;;  %v1587_v50 = vcombine.low %v2213_v28, %v2219_v30 }
  0x31   : > { %1664 = vmatprep.subr.bf16.mxu0 %v1981_v52  ;;  %v1992_v52 = vld [vmem:[%s2518_s3 + $0x20] sm:$0xff]  }
  0x32   : > { %1839 = vmatpush3.bf16.msra.mxu1 %v1982_v51  ;;  %v1991_v51 = vld [vmem:[%s2518_s3 + $0x18] sm:$0xff]  }
  0x33   : > { %1840 = vmatprep.subr.bf16.mxu1 %v1985_v54 }
  0x34   : > { %1665 = vmatpush3.bf16.msra.mxu0 %v1983_v53  ;;  %v1993_v53 = vld [vmem:[%s2518_s3 + $0x28] sm:$0xff]  }
  0x35   : > { %1666 = vmatprep.subr.bf16.mxu0 %v1984_v55  ;;  %v1995_v55 = vld [vmem:[%s2518_s3 + $0x38] sm:$0xff]  }
  0x36   : > { %1841 = vmatpush3.bf16.msra.mxu1 %v1985_v54  ;;  %v1994_v54 = vld [vmem:[%s2518_s3 + $0x30] sm:$0xff]  }
  0x37   : > { %1842 = vmatprep.subr.bf16.mxu1 %v1987_v57 }
  0x38   : > { %1667 = vmatpush3.bf16.msra.mxu0 %v1986_v56 }
  0x3a   : > { %1843 = vmatpush3.bf16.msra.mxu1 %v1987_v57 }
  0x3b   : > { %687 = vmatmul.mubr.bf16.vlgmr.msra.gmra.mrb[0].mxu0 %v1566_v58  ;;  %1860 = vmatprep.subr.bf16.mxu1 %v1988_v60  ;;  %v2372_v58 = vld [vmem:[%s2517_s2] ss:$0 sm:$0xff] }
  0x3c   : > { %694 = vmatprep.mubr.bf16.mxu0 %v1570_v59 }
  0x3d   : > { %1845 = vmatmul.mubr.bf16.vlgmr.msra.gmra.mrb[0].mxu1 %v1571_v61 }
  0x3e   : > { %1848 = vmatprep.mubr.bf16.mxu1 %v1574_v62  ;;  %1861 = vmatpush3.bf16.msra.mxu1 %v1988_v60 }
  0x3f   : > { %1862 = vmatprep.subr.bf16.mxu1 %v1989_v63 }
  0x42   : > { %1863 = vmatpush3.bf16.msra.mxu1 %v1989_v63 }
  0x43   : > { %695 = vmatmul.mubr.bf16.gmra.mrb[4].mxu0 %v1569_v32  ;;  %1864 = vmatprep.subr.bf16.mxu1 %v1990_v34 }
  0x44   : > { %702 = vmatprep.mubr.bf16.mxu0 %v1573_v33 }
  0x45   : > { %1849 = vmatmul.mubr.bf16.gmra.mrb[4].mxu1 %v1577_v35 }
  0x46   : > { %1852 = vmatprep.mubr.bf16.mxu1 %v1580_v36  ;;  %1865 = vmatpush3.bf16.msra.mxu1 %v1990_v34 }
  0x47   : > { %1866 = vmatprep.subr.bf16.mxu1 %v1991_v51 }
  0x4a   : > { %1867 = vmatpush3.bf16.msra.mxu1 %v1991_v51 }
  0x4b   : > { %703 = vmatmul.mubr.bf16.gmra.mrb[8].mxu0 %v1572_v37  ;;  %1868 = vmatprep.subr.bf16.mxu1 %v1992_v52 }
  0x4c   : > { %710 = vmatprep.mubr.bf16.mxu0 %v1576_v38 }
  0x4d   : > { %1853 = vmatmul.mubr.bf16.gmra.mrb[8].mxu1 %v1583_v39 }
  0x4e   : > { %1856 = vmatprep.mubr.bf16.mxu1 %v1586_v40  ;;  %1869 = vmatpush3.bf16.msra.mxu1 %v1992_v52 }
  0x4f   : > { %1870 = vmatprep.subr.bf16.mxu1 %v1993_v53 }
  0x52   : > { %1871 = vmatpush3.bf16.msra.mxu1 %v1993_v53 }
  0x53   : > { %711 = vmatmul.mubr.bf16.gmra.mrb[12].mxu0 %v1575_v41  ;;  %1872 = vmatprep.subr.bf16.mxu1 %v1994_v54 }
  0x54   : > { %718 = vmatprep.mubr.bf16.mxu0 %v1579_v42 }
  0x55   : > { %1857 = vmatmul.mubr.bf16.gmra.mrb[12].mxu1 %v1589_v43 }
  0x56   : > { %1873 = vmatpush3.bf16.msra.mxu1 %v1994_v54 }
  0x57   : > { %1874 = vmatprep.subr.bf16.mxu1 %v1995_v55 }
  0x5a   : > { %1875 = vmatpush3.bf16.msra.mxu1 %v1995_v55 }
  0x5b   : > { %719 = vmatmul.mubr.bf16.gmra.mrb[16].mxu0 %v1578_v44 }
  0x5c   : > { %726 = vmatprep.mubr.bf16.mxu0 %v1582_v45 }
  0x63   : > { %727 = vmatmul.mubr.bf16.gmra.mrb[20].mxu0 %v1581_v46 }
  0x64   : > { %734 = vmatprep.mubr.bf16.mxu0 %v1585_v47 }
  0x6b   : > { %735 = vmatmul.mubr.bf16.gmra.mrb[24].mxu0 %v1584_v48 }
  0x6c   : > { %742 = vmatprep.mubr.bf16.mxu0 %v1588_v49 }
  0x73   : > { %743 = vmatmul.mubr.bf16.gmra.mrb[28].mxu0 %v1587_v50 }
 0x10e   : > { %v1668_v56 = vpop.f32.mrb[0].mxu0 }
 0x10f   : > { %v1669_v57 = vpop.f32.mrb[1].mxu0 }
 0x110   : > { %v1670_v59 = vadd.f32 %v1669_v57, %v1668_v56  ;;  %v1671_v60 = vpop.f32.mrb[2].mxu0  ;;  %v1846_v62 = vpop.f32.mrb[0].mxu1 }
 0x111   : > { %v1672_v61 = vpop.f32.mrb[3].mxu0  ;;  %v785_v33 = vpop.f32.mrb[1].mxu1 }
 0x112   : > { %v1673_v63 = vadd.f32 %v1672_v61, %v1671_v60  ;;  %v689_v32 = vadd.f32 %v1670_v59, %v2372_v58  ;;  %v1847_v34 = vpop.f32.mrb[2].mxu1 }
 0x113   : > { %v788_v37 = vpop.f32.mrb[3].mxu1 }
 0x114   : > { %v786_v35 = vadd.f32 %v785_v33, %v689_v32  ;;  %v692_v36 = vadd.f32 %v1673_v63, %v2372_v58 }
 0x116   : > { %v848_v38 = vmax.f32 %v786_v35, 0.0  ;;  %v789_v39 = vadd.f32 %v788_v37, %v692_v36  ;;  %v1674_v40 = vpop.f32.mrb[4].mxu0 }
 0x117   : > { %v1675_v41 = vpop.f32.mrb[5].mxu0 }
 0x118   : > { %864 = vst [vmem:[%s2148_s20] sm:$0xff] %v848_v38  ;;  %v849_v42 = vmax.f32 %v789_v39, 0.0  ;;  %v1676_v43 = vadd.f32 %v1675_v41, %v1674_v40  ;;  %v1677_v44 = vpop.f32.mrb[6].mxu0  ;;  %v1850_v46 = vpop.f32.mrb[4].mxu1 }
 0x119   : > { %v1678_v45 = vpop.f32.mrb[7].mxu0  ;;  %v801_v50 = vpop.f32.mrb[5].mxu1 }
 0x11a   : > { %865 = vst [vmem:[%s2148_s20 + $0x8] sm:$0xff] %v849_v42  ;;  %v880_v47 = vpack.c.bf16 %v849_v42, %v848_v38  ;;  %v697_v48 = vadd.f32 %v1676_v43, %v2372_v58  ;;  %v1679_v49 = vadd.f32 %v1678_v45, %v1677_v44  ;;  %v1851_v51 = vpop.f32.mrb[6].mxu1 }
 0x11b   : > { %v804_v54 = vpop.f32.mrb[7].mxu1 }
 0x11c   : > { %v794_v52 = vadd.f32 %v1846_v62, %v697_v48  ;;  %v700_v53 = vadd.f32 %v1679_v49, %v2372_v58  ;;  %1876 = vmatprep.mubr.bf16.mxu1 %v880_v47 }
 0x11e   : > { %v850_v55 = vmax.f32 %v794_v52, 0.0  ;;  %v797_v56 = vadd.f32 %v1847_v34, %v700_v53  ;;  %v1680_v57 = vpop.f32.mrb[8].mxu0 }
 0x11f   : > { %v1681_v59 = vpop.f32.mrb[9].mxu0 }
 0x120   : > { %866 = vst [vmem:[%s2148_s20 + $0x10] sm:$0xff] %v850_v55  ;;  %v851_v60 = vmax.f32 %v797_v56, 0.0  ;;  %v1682_v61 = vadd.f32 %v1681_v59, %v1680_v57  ;;  %v1683_v63 = vpop.f32.mrb[10].mxu0  ;;  %v1854_v33 = vpop.f32.mrb[8].mxu1 }
 0x121   : > { %v1684_v32 = vpop.f32.mrb[11].mxu0  ;;  %v817_v37 = vpop.f32.mrb[9].mxu1 }
 0x122   : > { %867 = vst [vmem:[%s2148_s20 + $0x18] sm:$0xff] %v851_v60  ;;  %v881_v35 = vpack.c.bf16 %v851_v60, %v850_v55  ;;  %v1685_v36 = vadd.f32 %v1684_v32, %v1683_v63  ;;  %v705_v62 = vadd.f32 %v1682_v61, %v2372_v58  ;;  %v1855_v38 = vpop.f32.mrb[10].mxu1 }
 0x123   : > { %v820_v40 = vpop.f32.mrb[11].mxu1 }
 0x124   : > { %v802_v39 = vadd.f32 %v801_v50, %v705_v62  ;;  %1877 = vmatmul.mubr.bf16.vlgmr.msra.gmra.mrb[16].mxu1 %v881_v35  ;;  %v708_v34 = vadd.f32 %v1685_v36, %v2372_v58 }
 0x126   : > { %v852_v41 = vmax.f32 %v802_v39, 0.0  ;;  %v805_v42 = vadd.f32 %v804_v54, %v708_v34  ;;  %v1686_v43 = vpop.f32.mrb[12].mxu0 }
 0x127   : > { %v1687_v44 = vpop.f32.mrb[13].mxu0 }
 0x128   : > { %868 = vst [vmem:[%s2148_s20 + $0x20] sm:$0xff] %v852_v41  ;;  %v853_v45 = vmax.f32 %v805_v42, 0.0  ;;  %v1688_v47 = vadd.f32 %v1687_v44, %v1686_v43  ;;  %v1689_v48 = vpop.f32.mrb[14].mxu0  ;;  %v2385_v52 = vpop.f32.mrb[12].mxu1 }
 0x129   : > { %v1690_v49 = vpop.f32.mrb[15].mxu0  ;;  %v833_v56 = vpop.f32.mrb[13].mxu1 }
 0x12a   : > { %869 = vst [vmem:[%s2148_s20 + $0x28] sm:$0xff] %v853_v45  ;;  %v882_v53 = vpack.c.bf16 %v853_v45, %v852_v41  ;;  %v713_v50 = vadd.f32 %v1688_v47, %v2372_v58  ;;  %v1691_v55 = vadd.f32 %v1690_v49, %v1689_v48  ;;  %v2389_v57 = vpop.f32.mrb[14].mxu1 }
 0x12b   : > { %v836_v60 = vpop.f32.mrb[15].mxu1 }
 0x12c   : > { %v810_v54 = vadd.f32 %v1850_v46, %v713_v50  ;;  %v716_v59 = vadd.f32 %v1691_v55, %v2372_v58  ;;  %1880 = vmatprep.mubr.bf16.mxu1 %v882_v53 }
 0x12e   : > { %v854_v61 = vmax.f32 %v810_v54, 0.0  ;;  %v813_v63 = vadd.f32 %v1851_v51, %v716_v59  ;;  %v1692_v32 = vpop.f32.mrb[16].mxu0 }
 0x12f   : > { %v1693_v35 = vpop.f32.mrb[17].mxu0 }
 0x130   : > { %870 = vst [vmem:[%s2148_s20 + $0x30] sm:$0xff] %v854_v61  ;;  %v855_v36 = vmax.f32 %v813_v63, 0.0  ;;  %v1694_v62 = vadd.f32 %v1693_v35, %v1692_v32  ;;  %v1695_v39 = vpop.f32.mrb[18].mxu0 }
 0x131   : > { %v1696_v34 = vpop.f32.mrb[19].mxu0 }
 0x132   : > { %871 = vst [vmem:[%s2148_s20 + $0x38] sm:$0xff] %v855_v36  ;;  %v1697_v41 = vadd.f32 %v1696_v34, %v1695_v39  ;;  %v721_v42 = vadd.f32 %v1694_v62, %v2372_v58  ;;  %v883_v46 = vpack.c.bf16 %v855_v36, %v854_v61 }
 0x134   : > { %v818_v43 = vadd.f32 %v817_v37, %v721_v42  ;;  %1881 = vmatmul.mubr.bf16.gmra.mrb[20].mxu1 %v883_v46  ;;  %v724_v44 = vadd.f32 %v1697_v41, %v2372_v58 }
 0x136   : > { %v856_v45 = vmax.f32 %v818_v43, 0.0  ;;  %v821_v51 = vadd.f32 %v820_v40, %v724_v44  ;;  %v1698_v47 = vpop.f32.mrb[20].mxu0 }
 0x137   : > { %v1699_v48 = vpop.f32.mrb[21].mxu0 }
 0x138   : > { %872 = vst [vmem:[%s2148_s20 + $0x40] sm:$0xff] %v856_v45  ;;  %v857_v49 = vmax.f32 %v821_v51, 0.0  ;;  %v1700_v53 = vadd.f32 %v1699_v48, %v1698_v47  ;;  %v1701_v50 = vpop.f32.mrb[22].mxu0 }
 0x139   : > { %v1702_v55 = vpop.f32.mrb[23].mxu0 }
 0x13a   : > { %873 = vst [vmem:[%s2148_s20 + $0x48] sm:$0xff] %v857_v49  ;;  %v884_v54 = vpack.c.bf16 %v857_v49, %v856_v45  ;;  %v729_v59 = vadd.f32 %v1700_v53, %v2372_v58  ;;  %v1703_v61 = vadd.f32 %v1702_v55, %v1701_v50 }
 0x13c   : > { %v826_v37 = vadd.f32 %v1854_v33, %v729_v59  ;;  %v732_v63 = vadd.f32 %v1703_v61, %v2372_v58  ;;  %1884 = vmatprep.mubr.bf16.mxu1 %v884_v54 }
 0x13e   : > { %v858_v32 = vmax.f32 %v826_v37, 0.0  ;;  %v829_v40 = vadd.f32 %v1855_v38, %v732_v63  ;;  %v1704_v35 = vpop.f32.mrb[24].mxu0 }
 0x13f   : > { %v1705_v36 = vpop.f32.mrb[25].mxu0 }
 0x140   : > { %874 = vst [vmem:[%s2148_s20 + $0x50] sm:$0xff] %v858_v32  ;;  %v859_v62 = vmax.f32 %v829_v40, 0.0  ;;  %v1706_v39 = vadd.f32 %v1705_v36, %v1704_v35  ;;  %v1707_v34 = vpop.f32.mrb[26].mxu0 }
 0x141   : > { %v1708_v41 = vpop.f32.mrb[27].mxu0 }
 0x142   : > { %875 = vst [vmem:[%s2148_s20 + $0x58] sm:$0xff] %v859_v62  ;;  %v1709_v42 = vadd.f32 %v1708_v41, %v1707_v34  ;;  %v737_v46 = vadd.f32 %v1706_v39, %v2372_v58  ;;  %v885_v43 = vpack.c.bf16 %v859_v62, %v858_v32 }
 0x144   : > { %v834_v33 = vadd.f32 %v833_v56, %v737_v46  ;;  %1885 = vmatmul.mubr.bf16.gmra.mrb[24].mxu1 %v885_v43  ;;  %v740_v44 = vadd.f32 %v1709_v42, %v2372_v58 }
 0x146   : > { %v860_v45 = vmax.f32 %v834_v33, 0.0  ;;  %v837_v38 = vadd.f32 %v836_v60, %v740_v44  ;;  %v1710_v51 = vpop.f32.mrb[28].mxu0 }
 0x147   : > { %v1711_v47 = vpop.f32.mrb[29].mxu0 }
 0x148   : > { %876 = vst [vmem:[%s2148_s20 + $0x60] sm:$0xff] %v860_v45  ;;  %v861_v48 = vmax.f32 %v837_v38, 0.0  ;;  %v1712_v49 = vadd.f32 %v1711_v47, %v1710_v51  ;;  %v1713_v53 = vpop.f32.mrb[30].mxu0 }
 0x149   : > { %v1714_v50 = vpop.f32.mrb[31].mxu0 }
 0x14a   : > { %877 = vst [vmem:[%s2148_s20 + $0x68] sm:$0xff] %v861_v48  ;;  %v886_v55 = vpack.c.bf16 %v861_v48, %v860_v45  ;;  %v745_v54 = vadd.f32 %v1712_v49, %v2372_v58  ;;  %v1715_v56 = vadd.f32 %v1714_v50, %v1713_v53 }
 0x14c   : > { %v842_v59 = vadd.f32 %v2385_v52, %v745_v54  ;;  %v748_v61 = vadd.f32 %v1715_v56, %v2372_v58  ;;  %1888 = vmatprep.mubr.bf16.mxu1 %v886_v55 }
 0x14e   : > { %v862_v60 = vmax.f32 %v842_v59, 0.0  ;;  %v845_v37 = vadd.f32 %v2389_v57, %v748_v61 }
 0x150   : > { %878 = vst [vmem:[%s2148_s20 + $0x70] sm:$0xff] %v862_v60  ;;  %v863_v63 = vmax.f32 %v845_v37, 0.0 }
 0x152   : > { %879 = vst [vmem:[%s2148_s20 + $0x78] sm:$0xff] %v863_v63  ;;  %v887_v32 = vpack.c.bf16 %v863_v63, %v862_v60 }
 0x154   : > { %1889 = vmatmul.mubr.bf16.gmra.mrb[28].mxu1 %v887_v32 }
 0x1f7   : > { %v1878_v40 = vpop.f32.mrb[16].mxu1 }
 0x1f8   : > { %v986_v35 = vpop.f32.mrb[17].mxu1 }
 0x1f9   : > { %v1879_v36 = vpop.f32.mrb[18].mxu1 }
 0x1fa   : > { %v1050_v62 = vpack.c.bf16 %v1879_v36, %v1878_v40  ;;  %v989_v39 = vpop.f32.mrb[19].mxu1 }
 0x1fb   : > { %v1049_v52 = vpack.c.bf16 %v989_v39, %v986_v35 }
 0x1fc   : > { %1062 = vst [vmem:[%s1060_s29 + $0x8] sm:$0xff] %v1050_v62 }
 0x1fd   : > { %1061 = vst [vmem:[%s1060_s29] sm:$0xff] %v1049_v52 }
 0x207   : > { %v1882_v58 = vpop.f32.mrb[20].mxu1 }
 0x208   : > { %v1002_v34 = vpop.f32.mrb[21].mxu1 }
 0x209   : > { %v1883_v57 = vpop.f32.mrb[22].mxu1 }
 0x20a   : > { %v1052_v41 = vpack.c.bf16 %v1883_v57, %v1882_v58  ;;  %v1005_v42 = vpop.f32.mrb[23].mxu1 }
 0x20b   : > { %v1051_v46 = vpack.c.bf16 %v1005_v42, %v1002_v34 }
 0x20c   : > { %1064 = vst [vmem:[%s1060_s29 + $0x18] sm:$0xff] %v1052_v41 }
 0x20d   : > { %1063 = vst [vmem:[%s1060_s29 + $0x10] sm:$0xff] %v1051_v46 }
 0x217   : > { %v1886_v43 = vpop.f32.mrb[24].mxu1 }
 0x218   : > { %v1018_v33 = vpop.f32.mrb[25].mxu1 }
 0x219   : > { %v1887_v44 = vpop.f32.mrb[26].mxu1 }
 0x21a   : > { %v1054_v45 = vpack.c.bf16 %v1887_v44, %v1886_v43  ;;  %v1021_v38 = vpop.f32.mrb[27].mxu1 }
 0x21b   : > { %v1053_v51 = vpack.c.bf16 %v1021_v38, %v1018_v33 }
 0x21c   : > { %1066 = vst [vmem:[%s1060_s29 + $0x28] sm:$0xff] %v1054_v45 }
 0x21d   : > { %1065 = vst [vmem:[%s1060_s29 + $0x20] sm:$0xff] %v1053_v51 }
 0x227   : > { %v1890_v47 = vpop.f32.mrb[28].mxu1 }
 0x228   : > { %v1034_v48 = vpop.f32.mrb[29].mxu1 }
 0x229   : > { %v1891_v49 = vpop.f32.mrb[30].mxu1 }
 0x22a   : > { %v1056_v53 = vpack.c.bf16 %v1891_v49, %v1890_v47  ;;  %v1037_v50 = vpop.f32.mrb[31].mxu1 }
 0x22b   : > { %v1055_v55 = vpack.c.bf16 %v1037_v50, %v1034_v48 }
 0x22c   : > { %1068 = vst [vmem:[%s1060_s29 + $0x38] sm:$0xff] %v1056_v53 }
 0x22d   : > { %1067 = vst [vmem:[%s1060_s29 + $0x30] sm:$0xff] %v1055_v55 }
 0x22e PF: > { %p1623_p8 = scmp.ne.s32.totalorder %s2022_s22, 1 }
 0x22f   : > { %v1626_v61 = vcombine.high (!%p1623_p8), %v2119_v0, %v2125_v2  ;;  %v1627_v37 = vcombine.low (!%p1623_p8), %v2122_v1, %v2128_v3  ;;  %v1625_v38 = vcombine.low (!%p1623_p8), %v2119_v0, %v2125_v2  ;;  %v1630_v51 = vcombine.low (!%p1623_p8), %v2134_v5, %v2140_v7 }
 0x230   : > { %1072 = sbr.rel (%p1623_p8) target bundleno = 875 (0x36b), region = 48  ;;  %v1629_v47 = vcombine.high (!%p1623_p8), %v2131_v4, %v2137_v6  ;;  %v1633_v48 = vcombine.low (!%p1623_p8), %v2151_v9, %v2157_v11  ;;  %v1628_v49 = vcombine.low (!%p1623_p8), %v2131_v4, %v2137_v6  ;;  %v1632_v0 = vcombine.high (!%p1623_p8), %v2143_v8, %v2154_v10 }
 0x231   : > { %1264 = vmatprep.mubr.bf16.mxu0 (!%p1623_p8), %v1626_v61  ;;  %1908 = vmatprep.mubr.bf16.mxu1 (!%p1623_p8), %v1627_v37  ;;  %v1636_v2 = vcombine.low (!%p1623_p8), %v2168_v13, %v2174_v15  ;;  %v1639_v5 = vcombine.low (!%p1623_p8), %v2180_v17, %v2186_v19  ;;  %v1631_v7 = vcombine.low (!%p1623_p8), %v2143_v8, %v2154_v10 }
 0x232   : > { %v1635_v9 = vcombine.high (!%p1623_p8), %v2165_v12, %v2171_v14  ;;  %v1642_v4 = vcombine.low (!%p1623_p8), %v2192_v21, %v2198_v23  ;;  %v1645_v6 = vcombine.low (!%p1623_p8), %v2204_v25, %v2210_v27  ;;  %v1634_v11 = vcombine.low (!%p1623_p8), %v2165_v12, %v2171_v14 }
 0x233   : > { %v1638_v13 = vcombine.high (!%p1623_p8), %v2177_v16, %v2183_v18  ;;  %v1648_v8 = vcombine.low (!%p1623_p8), %v2216_v29, %v2222_v31  ;;  %v1637_v10 = vcombine.low (!%p1623_p8), %v2177_v16, %v2183_v18  ;;  %v1641_v15 = vcombine.high (!%p1623_p8), %v2189_v20, %v2195_v22 }
 0x234   : > { %v1081_v54 = vld [vmem:[#allocation2 + $0x40] sm:$0xff] (!%p1623_p8)  ;;  %v1082_v59 = vld [vmem:[#allocation2 + $0x48] sm:$0xff] (!%p1623_p8)  ;;  %v1083_v40 = vld [vmem:[#allocation2 + $0x50] sm:$0xff] (!%p1623_p8)  ;;  %v1640_v12 = vcombine.low (!%p1623_p8), %v2189_v20, %v2195_v22  ;;  %v1644_v14 = vcombine.high (!%p1623_p8), %v2201_v24, %v2207_v26  ;;  %v1643_v17 = vcombine.low (!%p1623_p8), %v2201_v24, %v2207_v26  ;;  %v1647_v19 = vcombine.high (!%p1623_p8), %v2213_v28, %v2219_v30 }
 0x235   : > { %v1073_v56 = vld [vmem:[#allocation2] sm:$0xff] (!%p1623_p8)  ;;  %1748 = vmatprep.subr.bf16.mxu0 (!%p1623_p8), %v1081_v54  ;;  %v1090_v63 = vld [vmem:[#allocation2 + $0x88] sm:$0xff] (!%p1623_p8)  ;;  %v1091_v35 = vld [vmem:[#allocation2 + $0x90] sm:$0xff] (!%p1623_p8)  ;;  %v1646_v16 = vcombine.low (!%p1623_p8), %v2213_v28, %v2219_v30 }
 0x236   : > { %v1089_v60 = vld [vmem:[#allocation2 + $0x80] sm:$0xff] (!%p1623_p8)  ;;  %1749 = vmatpush3.bf16.msra.mxu0 (!%p1623_p8), %v1073_v56  ;;  %v1074_v32 = vld [vmem:[#allocation2 + $0x8] sm:$0xff] (!%p1623_p8)  ;;  %v1075_v36 = vld [vmem:[#allocation2 + $0x10] sm:$0xff] (!%p1623_p8) }
 0x237   : > { %1892 = vmatprep.subr.bf16.mxu1 %v1089_v60  ;;  %1750 = vmatprep.subr.bf16.mxu0 %v1082_v59  ;;  %v1084_v62 = vld [vmem:[#allocation2 + $0x58] sm:$0xff]  ;;  %v1085_v3 = vld [vmem:[#allocation2 + $0x60] sm:$0xff]  ;;  %v1086_v34 = vld [vmem:[#allocation2 + $0x68] sm:$0xff] }
 0x238   : > { %1893 = vmatpush3.bf16.msra.mxu1 %v1089_v60  ;;  %v1092_v39 = vld [vmem:[#allocation2 + $0x98] sm:$0xff]  ;;  %v1093_v52 = vld [vmem:[#allocation2 + $0xa0] sm:$0xff]  ;;  %v1094_v57 = vld [vmem:[#allocation2 + $0xa8] sm:$0xff] }
 0x239   : > { %1894 = vmatprep.subr.bf16.mxu1 %v1090_v63  ;;  %v1076_v1 = vld [vmem:[#allocation2 + $0x18] sm:$0xff]  ;;  %v1077_v58 = vld [vmem:[#allocation2 + $0x20] sm:$0xff]  ;;  %v1078_v41 = vld [vmem:[#allocation2 + $0x28] sm:$0xff] }
 0x23a   : > { %1751 = vmatpush3.bf16.msra.mxu0 %v1074_v32  ;;  %v1087_v42 = vld [vmem:[#allocation2 + $0x70] sm:$0xff]  ;;  %v1088_v33 = vld [vmem:[#allocation2 + $0x78] sm:$0xff]  ;;  %v2466_v22 = vld [vmem:[%s2519_s4] ss:$0 sm:$0xff] }
 0x23b   : > { %1752 = vmatprep.subr.bf16.mxu0 %v1083_v40  ;;  %v1095_v46 = vld [vmem:[#allocation2 + $0xb0] sm:$0xff]  ;;  %v1096_v44 = vld [vmem:[#allocation2 + $0xb8] sm:$0xff] }
 0x23c   : > { %1895 = vmatpush3.bf16.msra.mxu1 %v1090_v63  ;;  %v1079_v43 = vld [vmem:[#allocation2 + $0x30] sm:$0xff]  ;;  %v1080_v45 = vld [vmem:[#allocation2 + $0x38] sm:$0xff] }
 0x23d   : > { %1896 = vmatprep.subr.bf16.mxu1 %v1091_v35 }
 0x23e   : > { %1753 = vmatpush3.bf16.msra.mxu0 %v1075_v36 }
 0x23f   : > { %1754 = vmatprep.subr.bf16.mxu0 %v1084_v62 }
 0x240   : > { %1897 = vmatpush3.bf16.msra.mxu1 %v1091_v35 }
 0x241   : > { %1898 = vmatprep.subr.bf16.mxu1 %v1092_v39 }
 0x242   : > { %1755 = vmatpush3.bf16.msra.mxu0 %v1076_v1 }
 0x243   : > { %1756 = vmatprep.subr.bf16.mxu0 %v1085_v3 }
 0x244   : > { %1899 = vmatpush3.bf16.msra.mxu1 %v1092_v39 }
 0x245   : > { %1900 = vmatprep.subr.bf16.mxu1 %v1093_v52 }
 0x246   : > { %1757 = vmatpush3.bf16.msra.mxu0 %v1077_v58 }
 0x247   : > { %1758 = vmatprep.subr.bf16.mxu0 %v1086_v34 }
 0x248   : > { %1901 = vmatpush3.bf16.msra.mxu1 %v1093_v52 }
 0x249   : > { %1902 = vmatprep.subr.bf16.mxu1 %v1094_v57 }
 0x24a   : > { %1759 = vmatpush3.bf16.msra.mxu0 %v1078_v41 }
 0x24b   : > { %1760 = vmatprep.subr.bf16.mxu0 %v1087_v42 }
 0x24c   : > { %1903 = vmatpush3.bf16.msra.mxu1 %v1094_v57 }
 0x24d   : > { %1904 = vmatprep.subr.bf16.mxu1 %v1095_v46 }
 0x24e   : > { %1761 = vmatpush3.bf16.msra.mxu0 %v1079_v43 }
 0x24f   : > { %1762 = vmatprep.subr.bf16.mxu0 %v1088_v33 }
 0x250   : > { %1905 = vmatpush3.bf16.msra.mxu1 %v1095_v46 }
 0x251   : > { %1906 = vmatprep.subr.bf16.mxu1 %v1096_v44 }
 0x252   : > { %1763 = vmatpush3.bf16.msra.mxu0 %v1080_v45 }
 0x254   : > { %1907 = vmatpush3.bf16.msra.mxu1 %v1096_v44 }
 0x255   : > { %1265 = vmatmul.mubr.bf16.vlgmr.msra.gmra.mrb[0].mxu0 %v1625_v38 }
 0x256   : > { %1272 = vmatprep.mubr.bf16.mxu0 %v1629_v47 }
 0x257   : > { %1909 = vmatmul.mubr.bf16.vlgmr.msra.gmra.mrb[0].mxu1 %v1630_v51 }
 0x258   : > { %1912 = vmatprep.mubr.bf16.mxu1 %v1633_v48 }
 0x25d   : > { %1273 = vmatmul.mubr.bf16.gmra.mrb[4].mxu0 %v1628_v49 }
 0x25e   : > { %1280 = vmatprep.mubr.bf16.mxu0 %v1632_v0 }
 0x25f   : > { %1913 = vmatmul.mubr.bf16.gmra.mrb[4].mxu1 %v1636_v2 }
 0x260   : > { %1916 = vmatprep.mubr.bf16.mxu1 %v1639_v5 }
 0x265   : > { %1281 = vmatmul.mubr.bf16.gmra.mrb[8].mxu0 %v1631_v7 }
 0x266   : > { %1288 = vmatprep.mubr.bf16.mxu0 %v1635_v9 }
 0x267   : > { %1917 = vmatmul.mubr.bf16.gmra.mrb[8].mxu1 %v1642_v4 }
 0x268   : > { %1920 = vmatprep.mubr.bf16.mxu1 %v1645_v6 }
 0x26d   : > { %1289 = vmatmul.mubr.bf16.gmra.mrb[12].mxu0 %v1634_v11 }
 0x26e   : > { %1296 = vmatprep.mubr.bf16.mxu0 %v1638_v13 }
 0x26f   : > { %1921 = vmatmul.mubr.bf16.gmra.mrb[12].mxu1 %v1648_v8 }
 0x275   : > { %1297 = vmatmul.mubr.bf16.gmra.mrb[16].mxu0 %v1637_v10 }
 0x276   : > { %1304 = vmatprep.mubr.bf16.mxu0 %v1641_v15 }
 0x27d   : > { %1305 = vmatmul.mubr.bf16.gmra.mrb[20].mxu0 %v1640_v12 }
 0x27e   : > { %1312 = vmatprep.mubr.bf16.mxu0 %v1644_v14 }
 0x285   : > { %1313 = vmatmul.mubr.bf16.gmra.mrb[24].mxu0 %v1643_v17 }
 0x286   : > { %1320 = vmatprep.mubr.bf16.mxu0 %v1647_v19 }
 0x28d   : > { %1321 = vmatmul.mubr.bf16.gmra.mrb[28].mxu0 %v1646_v16 }
 0x328   : > { %v1764_v18 = vpop.f32.mrb[0].mxu0 }
 0x329   : > { %v1765_v20 = vpop.f32.mrb[1].mxu0 }
 0x32a   : > { %v1910_v21 = vpop.f32.mrb[0].mxu1  ;;  %v1766_v23 = vadd.f32 %v1765_v20, %v1764_v18  ;;  %v1767_v24 = vpop.f32.mrb[2].mxu0 }
 0x32b   : > { %v1363_v25 = vpop.f32.mrb[1].mxu1  ;;  %v1768_v26 = vpop.f32.mrb[3].mxu0 }
 0x32c   : > { %v1911_v27 = vpop.f32.mrb[2].mxu1  ;;  %v1769_v29 = vadd.f32 %v1768_v26, %v1767_v24  ;;  %v1267_v31 = vadd.f32 %v1766_v23, %v2466_v22 }
 0x32d   : > { %v1366_v28 = vpop.f32.mrb[3].mxu1 }
 0x32e   : > { %v1364_v30 = vadd.f32 %v1363_v25, %v1267_v31  ;;  %v1270_v53 = vadd.f32 %v1769_v29, %v2466_v22 }
 0x330   : > { %1426 = vst [vmem:[%s2162_s8] sm:$0xff] %v1364_v30  ;;  %v1367_v50 = vadd.f32 %v1366_v28, %v1270_v53  ;;  %v1770_v55 = vpop.f32.mrb[4].mxu0 }
 0x331   : > { %v1771_v54 = vpop.f32.mrb[5].mxu0 }
 0x332   : > { %v1914_v56 = vpop.f32.mrb[4].mxu1  ;;  %1427 = vst [vmem:[%s2162_s8 + $0x8] sm:$0xff] %v1367_v50  ;;  %v1772_v59 = vadd.f32 %v1771_v54, %v1770_v55  ;;  %v1773_v61 = vpop.f32.mrb[6].mxu0 }
 0x333   : > { %v1379_v60 = vpop.f32.mrb[5].mxu1  ;;  %v1774_v37 = vpop.f32.mrb[7].mxu0 }
 0x334   : > { %v1915_v63 = vpop.f32.mrb[6].mxu1  ;;  %v1275_v32 = vadd.f32 %v1772_v59, %v2466_v22  ;;  %v1775_v40 = vadd.f32 %v1774_v37, %v1773_v61 }
 0x335   : > { %v1382_v35 = vpop.f32.mrb[7].mxu1 }
 0x336   : > { %v1372_v36 = vadd.f32 %v1910_v21, %v1275_v32  ;;  %v1278_v62 = vadd.f32 %v1775_v40, %v2466_v22 }
 0x338   : > { %1428 = vst [vmem:[%s2162_s8 + $0x10] sm:$0xff] %v1372_v36  ;;  %v1375_v39 = vadd.f32 %v1911_v27, %v1278_v62  ;;  %v1776_v1 = vpop.f32.mrb[8].mxu0 }
 0x339   : > { %v1777_v3 = vpop.f32.mrb[9].mxu0 }
 0x33a   : > { %v1918_v52 = vpop.f32.mrb[8].mxu1  ;;  %1429 = vst [vmem:[%s2162_s8 + $0x18] sm:$0xff] %v1375_v39  ;;  %v1778_v58 = vadd.f32 %v1777_v3, %v1776_v1  ;;  %v1779_v34 = vpop.f32.mrb[10].mxu0 }
 0x33b   : > { %v1395_v57 = vpop.f32.mrb[9].mxu1  ;;  %v1780_v41 = vpop.f32.mrb[11].mxu0 }
 0x33c   : > { %v1919_v42 = vpop.f32.mrb[10].mxu1  ;;  %v1781_v46 = vadd.f32 %v1780_v41, %v1779_v34  ;;  %v1283_v43 = vadd.f32 %v1778_v58, %v2466_v22 }
 0x33d   : > { %v1398_v33 = vpop.f32.mrb[11].mxu1 }
 0x33e   : > { %v1380_v44 = vadd.f32 %v1379_v60, %v1283_v43  ;;  %v1286_v45 = vadd.f32 %v1781_v46, %v2466_v22 }
 0x340   : > { %1430 = vst [vmem:[%s2162_s8 + $0x20] sm:$0xff] %v1380_v44  ;;  %v1383_v38 = vadd.f32 %v1382_v35, %v1286_v45  ;;  %v1782_v51 = vpop.f32.mrb[12].mxu0 }
 0x341   : > { %v1783_v47 = vpop.f32.mrb[13].mxu0 }
 0x342   : > { %v1922_v48 = vpop.f32.mrb[12].mxu1  ;;  %1431 = vst [vmem:[%s2162_s8 + $0x28] sm:$0xff] %v1383_v38  ;;  %v1784_v49 = vadd.f32 %v1783_v47, %v1782_v51  ;;  %v1785_v0 = vpop.f32.mrb[14].mxu0 }
 0x343   : > { %v1411_v2 = vpop.f32.mrb[13].mxu1  ;;  %v1786_v5 = vpop.f32.mrb[15].mxu0 }
 0x344   : > { %v1923_v7 = vpop.f32.mrb[14].mxu1  ;;  %v1291_v9 = vadd.f32 %v1784_v49, %v2466_v22  ;;  %v1787_v4 = vadd.f32 %v1786_v5, %v1785_v0 }
 0x345   : > { %v1414_v6 = vpop.f32.mrb[15].mxu1 }
 0x346   : > { %v1388_v11 = vadd.f32 %v1914_v56, %v1291_v9  ;;  %v1294_v13 = vadd.f32 %v1787_v4, %v2466_v22 }
 0x348   : > { %1432 = vst [vmem:[%s2162_s8 + $0x30] sm:$0xff] %v1388_v11  ;;  %v1391_v8 = vadd.f32 %v1915_v63, %v1294_v13  ;;  %v1788_v10 = vpop.f32.mrb[16].mxu0 }
 0x349   : > { %v1789_v15 = vpop.f32.mrb[17].mxu0 }
 0x34a   : > { %1433 = vst [vmem:[%s2162_s8 + $0x38] sm:$0xff] %v1391_v8  ;;  %v1790_v12 = vadd.f32 %v1789_v15, %v1788_v10  ;;  %v1791_v14 = vpop.f32.mrb[18].mxu0 }
 0x34b   : > { %v1792_v17 = vpop.f32.mrb[19].mxu0 }
 0x34c   : > { %v1793_v19 = vadd.f32 %v1792_v17, %v1791_v14  ;;  %v1299_v16 = vadd.f32 %v1790_v12, %v2466_v22 }
 0x34e   : > { %v1396_v18 = vadd.f32 %v1395_v57, %v1299_v16  ;;  %v1302_v20 = vadd.f32 %v1793_v19, %v2466_v22 }
 0x350   : > { %1434 = vst [vmem:[%s2162_s8 + $0x40] sm:$0xff] %v1396_v18  ;;  %v1399_v21 = vadd.f32 %v1398_v33, %v1302_v20  ;;  %v1794_v23 = vpop.f32.mrb[20].mxu0 }
 0x351   : > { %v1795_v24 = vpop.f32.mrb[21].mxu0 }
 0x352   : > { %1435 = vst [vmem:[%s2162_s8 + $0x48] sm:$0xff] %v1399_v21  ;;  %v1796_v25 = vadd.f32 %v1795_v24, %v1794_v23  ;;  %v1797_v26 = vpop.f32.mrb[22].mxu0 }
 0x353   : > { %v1798_v27 = vpop.f32.mrb[23].mxu0 }
 0x354   : > { %v1307_v29 = vadd.f32 %v1796_v25, %v2466_v22  ;;  %v1799_v31 = vadd.f32 %v1798_v27, %v1797_v26 }
 0x356   : > { %v1404_v28 = vadd.f32 %v1918_v52, %v1307_v29  ;;  %v1310_v30 = vadd.f32 %v1799_v31, %v2466_v22 }
 0x358   : > { %1436 = vst [vmem:[%s2162_s8 + $0x50] sm:$0xff] %v1404_v28  ;;  %v1407_v53 = vadd.f32 %v1919_v42, %v1310_v30  ;;  %v1800_v50 = vpop.f32.mrb[24].mxu0 }
 0x359   : > { %v1801_v55 = vpop.f32.mrb[25].mxu0 }
 0x35a   : > { %1437 = vst [vmem:[%s2162_s8 + $0x58] sm:$0xff] %v1407_v53  ;;  %v1802_v54 = vadd.f32 %v1801_v55, %v1800_v50  ;;  %v1803_v56 = vpop.f32.mrb[26].mxu0 }
 0x35b   : > { %v1804_v59 = vpop.f32.mrb[27].mxu0 }
 0x35c   : > { %v1805_v61 = vadd.f32 %v1804_v59, %v1803_v56  ;;  %v1315_v60 = vadd.f32 %v1802_v54, %v2466_v22 }
 0x35e   : > { %v1412_v37 = vadd.f32 %v1411_v2, %v1315_v60  ;;  %v1318_v63 = vadd.f32 %v1805_v61, %v2466_v22 }
 0x360   : > { %1438 = vst [vmem:[%s2162_s8 + $0x60] sm:$0xff] %v1412_v37  ;;  %v1415_v32 = vadd.f32 %v1414_v6, %v1318_v63  ;;  %v1806_v40 = vpop.f32.mrb[28].mxu0 }
 0x361   : > { %v1807_v35 = vpop.f32.mrb[29].mxu0 }
 0x362   : > { %1439 = vst [vmem:[%s2162_s8 + $0x68] sm:$0xff] %v1415_v32  ;;  %v1808_v36 = vadd.f32 %v1807_v35, %v1806_v40  ;;  %v1809_v62 = vpop.f32.mrb[30].mxu0 }
 0x363   : > { %v1810_v39 = vpop.f32.mrb[31].mxu0 }
 0x364   : > { %v1323_v1 = vadd.f32 %v1808_v36, %v2466_v22  ;;  %v1811_v3 = vadd.f32 %v1810_v39, %v1809_v62 }
 0x366   : > { %v1420_v52 = vadd.f32 %v1922_v48, %v1323_v1  ;;  %v1326_v58 = vadd.f32 %v1811_v3, %v2466_v22 }
 0x368   : > { %1440 = vst [vmem:[%s2162_s8 + $0x70] sm:$0xff] %v1420_v52  ;;  %v1423_v34 = vadd.f32 %v1923_v7, %v1326_v58 }
 0x36a   : > { %1441 = vst [vmem:[%s2162_s8 + $0x78] sm:$0xff] %v1423_v34 }
 0x36b PF: > { %s17_s25 = sadd.s32 1, %s2034_s25   ;;  %s2522_s21 = smov %s2026_s23 }
 0x36c   : > { %p14_p9 = scmp.ge.s32.totalorder %s17_s25, 8   ;;  %s2523_s22 = smov %s2030_s24 }
 0x36d   : > { %s2524_s23 = smov %s2527_s26  ;;  %s2525_s24 = smov %s2531_s27 }
 0x36e   :  { %16 = sbr.rel (!%p14_p9) target bundleno = 3 (0x3), region = 89 }

</bundles_post_ra>
